<compile_context>
chip_gen: v7x
topology: tpu7x:2x2x1
jax: 0.10.0
libtpu: 0.0.40
codegen_flags: <defaults>
</compile_context>

<pallas_src>
import functools

import jax
import jax.numpy as jnp
from jax.experimental import pallas as pl
from jax.experimental.pallas import tpu as pltpu

LANE = 128                             # pad feature dims to the 128-lane width
H_RESIDENT_BYTES = 8 * 1024 * 1024     # keep h fully VMEM-resident below this
VMEM_LIMIT = 64 * 1024 * 1024          # explicit scoped-VMEM ceiling (v5e default 16 MiB)
COL_TILE_CAP = 512                     # cap on linear-layer output-column tiles


def _round_up(v, m):
    return ((v + m - 1) // m) * m


def _pick_tile(n):
    # Keep >= 2 row tiles so the "parallel" row axis can split across v7x's
    # two TensorCores; use bigger tiles once the graph is large enough.
    return 512 if n >= 1024 else 256


def _col_tile(f_out_p):
    if f_out_p <= COL_TILE_CAP:
        return f_out_p
    t = COL_TILE_CAP
    while f_out_p % t:
        t -= LANE
    return t


def _pad2(a, rows, cols, dtype):
    out = jnp.zeros((rows, cols), dtype)
    return out.at[: a.shape[0], : a.shape[1]].set(a.astype(dtype))


# --------------------------------------------------------------------------- #
# Kernels
# --------------------------------------------------------------------------- #
def linear_kernel(x_ref, w_ref, o_ref):
    """h = x @ W_l  (features to be aggregated; transform-first path)."""
    o_ref[...] = jnp.dot(x_ref[...], w_ref[...],
                         preferred_element_type=jnp.float32).astype(o_ref.dtype)


def combine_linear_kernel(agg_ref, x_ref, wl_ref, wr_ref, b_ref, out_ref, *,
                          apply_relu):
    """out = agg @ W_l + x @ W_r + b (+ ReLU)   (aggregate-first path)."""
    out = (jnp.dot(agg_ref[...], wl_ref[...], preferred_element_type=jnp.float32)
           + jnp.dot(x_ref[...], wr_ref[...], preferred_element_type=jnp.float32)
           + b_ref[...])
    if apply_relu:
        out = jnp.maximum(out, 0.0)
    out_ref[...] = out.astype(out_ref.dtype)


def aggregate_kernel(adj_ref, h_ref, inv_ref, *rest, has_root, apply_relu,
                     resident_h, tile_k):
    """out = [ReLU]( inv_deg * sum_k A[i,k] @ h[k]  (+ x[i] @ W_r + b) ).

    fp32 VMEM accumulator; int8 adjacency upcast to bf16 in-kernel; optional
    fused root transform in the k == last finalize (no r round-trip)."""
    if has_root:
        x_ref, wr_ref, b_ref, out_ref, acc_ref = rest
    else:
        out_ref, acc_ref = rest
    k = pl.program_id(1)

    @pl.when(k == 0)
    def _():
        acc_ref[...] = jnp.zeros_like(acc_ref)

    # 0/1 int8 adjacency -> bf16 is exact; the VPU upcast hides under the DMA.
    adj = adj_ref[...].astype(jnp.float32).astype(jnp.bfloat16)
    if resident_h:
        start = pl.multiple_of(k * tile_k, tile_k)
        h = h_ref[pl.ds(start, tile_k), :]
    else:
        h = h_ref[...]
    acc_ref[...] += jnp.dot(adj, h, preferred_element_type=jnp.float32)

    @pl.when(k == pl.num_programs(1) - 1)
    def _():
        out = acc_ref[...] * inv_ref[...]          # mean normalization in fp32
        if has_root:
            out = out + jnp.dot(x_ref[...], wr_ref[...],
                                preferred_element_type=jnp.float32) + b_ref[...]
        if apply_relu:
            out = jnp.maximum(out, 0.0)
        out_ref[...] = out.astype(out_ref.dtype)


# --------------------------------------------------------------------------- #
# pallas_call wrappers
# --------------------------------------------------------------------------- #
def _linear(x, w, tile_m):
    n_p, f_in_p = x.shape
    f_out_p = w.shape[1]
    tn = _col_tile(f_out_p)
    grid = (n_p // tile_m, f_out_p // tn)
    flops = 2 * n_p * f_in_p * f_out_p
    bytes_accessed = int(x.size * 2 * grid[1] + w.size * 2 + n_p * f_out_p * 2)
    return pl.pallas_call(
        linear_kernel,
        out_shape=jax.ShapeDtypeStruct((n_p, f_out_p), jnp.bfloat16),
        grid=grid,
        in_specs=[
            pl.BlockSpec((tile_m, f_in_p), lambda i, j: (i, 0)),
            pl.BlockSpec((f_in_p, tn), lambda i, j: (0, j)),
        ],
        out_specs=pl.BlockSpec((tile_m, tn), lambda i, j: (i, j)),
        compiler_params=pltpu.CompilerParams(
            dimension_semantics=("parallel", "parallel"),
            vmem_limit_bytes=VMEM_LIMIT),
        cost_estimate=pl.CostEstimate(flops=flops, transcendentals=0,
                                      bytes_accessed=bytes_accessed),
    )(x, w)


def _combine_linear(agg, x, w_l, w_r, b, tile_m, *, apply_relu, out_dtype):
    n_p, f_in_p = x.shape
    f_out_p = w_l.shape[1]
    tn = _col_tile(f_out_p)
    grid = (n_p // tile_m, f_out_p // tn)
    kernel = functools.partial(combine_linear_kernel, apply_relu=apply_relu)
    flops = 4 * n_p * f_in_p * f_out_p
    bytes_accessed = int((agg.size + x.size) * 2 + (w_l.size + w_r.size) * 2
                         + b.size * 4
                         + n_p * f_out_p * jnp.dtype(out_dtype).itemsize)
    return pl.pallas_call(
        kernel,
        out_shape=jax.ShapeDtypeStruct((n_p, f_out_p), out_dtype),
        grid=grid,
        in_specs=[
            pl.BlockSpec((tile_m, f_in_p), lambda i, j: (i, 0)),   # agg
            pl.BlockSpec((tile_m, f_in_p), lambda i, j: (i, 0)),   # x
            pl.BlockSpec((f_in_p, tn), lambda i, j: (0, j)),       # W_l
            pl.BlockSpec((f_in_p, tn), lambda i, j: (0, j)),       # W_r
            pl.BlockSpec((1, tn), lambda i, j: (0, j)),            # bias (fp32)
        ],
        out_specs=pl.BlockSpec((tile_m, tn), lambda i, j: (i, j)),
        compiler_params=pltpu.CompilerParams(
            dimension_semantics=("parallel", "parallel"),
            vmem_limit_bytes=VMEM_LIMIT),
        cost_estimate=pl.CostEstimate(flops=flops, transcendentals=0,
                                      bytes_accessed=bytes_accessed),
    )(agg, x, w_l, w_r, b)


def _aggregate(adj, h, inv_deg, tile, *, x=None, w_r=None, b=None,
               apply_relu=False, out_dtype=jnp.bfloat16):
    n_p = adj.shape[0]
    f = h.shape[1]
    tile_m = tile_k = tile
    grid = (n_p // tile_m, n_p // tile_k)
    resident_h = (n_p * f * 2) <= H_RESIDENT_BYTES   # keep h in VMEM once
    has_root = x is not None
    kernel = functools.partial(aggregate_kernel, has_root=has_root,
                               apply_relu=apply_relu, resident_h=resident_h,
                               tile_k=tile_k)
    h_spec = (pl.BlockSpec((n_p, f), lambda i, k: (0, 0)) if resident_h
              else pl.BlockSpec((tile_k, f), lambda i, k: (k, 0)))
    in_specs = [
        pl.BlockSpec((tile_m, tile_k), lambda i, k: (i, k)),   # adjacency int8
        h_spec,
        pl.BlockSpec((tile_m, 1), lambda i, k: (i, 0)),        # 1/deg (fp32)
    ]
    args = [adj, h, inv_deg]
    if has_root:
        f_in_p = x.shape[1]
        # TODO(synk): for very large f_in*f the resident W_r block could be
        # column-tiled as in the linear kernels; not needed at these sizes.
        in_specs += [
            pl.BlockSpec((tile_m, f_in_p), lambda i, k: (i, 0)),   # x row tile
            pl.BlockSpec((f_in_p, f), lambda i, k: (0, 0)),        # W_r resident
            pl.BlockSpec((1, f), lambda i, k: (0, 0)),             # bias (fp32)
        ]
        args += [x, w_r, b]
    flops = 2 * n_p * n_p * f + (2 * n_p * x.shape[1] * f if has_root else 0)
    h_bytes = h.size * 2 if resident_h else grid[0] * h.size * 2
    bytes_accessed = int(adj.size + h_bytes
                         + ((x.size + w_r.size) * 2 + b.size * 4 if has_root else 0)
                         + n_p * f * jnp.dtype(out_dtype).itemsize)
    return pl.pallas_call(
        kernel,
        out_shape=jax.ShapeDtypeStruct((n_p, f), out_dtype),
        grid=grid,
        in_specs=in_specs,
        out_specs=pl.BlockSpec((tile_m, f), lambda i, k: (i, 0)),
        scratch_shapes=[pltpu.VMEM((tile_m, f), jnp.float32)],
        compiler_params=pltpu.CompilerParams(
            dimension_semantics=("parallel", "arbitrary"),
            vmem_limit_bytes=VMEM_LIMIT),
        cost_estimate=pl.CostEstimate(flops=flops, transcendentals=0,
                                      bytes_accessed=bytes_accessed),
    )(*args)


# --------------------------------------------------------------------------- #
# Model wrapper
# --------------------------------------------------------------------------- #
def prepare_graph(adj):
    """Precompute padded int8 adjacency, 1/deg, and tile size once per graph
    (static across forward calls -> hoisted out of sage_forward)."""
    n = adj.shape[0]
    tile = _pick_tile(n)
    n_p = _round_up(n, tile)
    deg = jnp.maximum(adj.astype(jnp.float32).sum(axis=1, keepdims=True), 1.0)
    inv_deg = jnp.zeros((n_p, 1), jnp.float32).at[:n, :].set(1.0 / deg)
    # 0/1 adjacency is exact in int8: halves HBM traffic vs bf16 on the
    # dominant N^2 stream; upcast to bf16 happens on the VPU inside the kernel.
    adj_p = jnp.zeros((n_p, n_p), jnp.int8).at[:n, :n].set(adj.astype(jnp.int8))
    return adj_p, inv_deg, tile


def sage_layer(adj_p, inv_deg, x_p, w_l, w_r, b, tile, apply_relu, out_dtype):
    """One SAGEConv layer.  Mean aggregation is linear, so pick the order that
    minimizes the feature width of the N^2 aggregation matmul."""
    f_in_p, f_out_p = w_l.shape
    if f_out_p <= f_in_p:
        # transform-first: aggregate the narrower lin_l(x); the root transform
        # x @ W_r + b is fused into the aggregation finalize (no r round-trip).
        h = _linear(x_p, w_l, tile)
        return _aggregate(adj_p, h, inv_deg, tile, x=x_p, w_r=w_r, b=b,
                          apply_relu=apply_relu, out_dtype=out_dtype)
    # aggregate-first on the narrower raw features, then combine both linears.
    agg = _aggregate(adj_p, x_p, inv_deg, tile,
                     apply_relu=False, out_dtype=jnp.bfloat16)
    return _combine_linear(agg, x_p, w_l, w_r, b, tile,
                           apply_relu=apply_relu, out_dtype=out_dtype)


def sage_forward(x, adj_p, inv_deg, tile, params, dropout=0.5, training=False):
    """Forward of the SAGE module on a prepared graph.
    `params` is a list of (W_l, W_r, b) per layer (W stored [f_in, f_out])."""
    n = x.shape[0]
    n_p = adj_p.shape[0]
    # Activations flow between layers padded to 128 lanes, in bf16.
    x_p = _pad2(x, n_p, _round_up(x.shape[1], LANE), jnp.bfloat16)

    num_layers = len(params)
    f_out_final = params[-1][0].shape[1]
    for li, (w_l, w_r, b) in enumerate(params):
        last = li == num_layers - 1
        f_in_p = x_p.shape[1]
        f_out_p = _round_up(w_l.shape[1], LANE)
        w_l_p = _pad2(w_l, f_in_p, f_out_p, jnp.bfloat16)
        w_r_p = _pad2(w_r, f_in_p, f_out_p, jnp.bfloat16)
        b_p = _pad2(jnp.reshape(b, (1, -1)), 1, f_out_p, jnp.float32)
        out_dtype = jnp.float32 if last else jnp.bfloat16
        x_p = sage_layer(adj_p, inv_deg, x_p, w_l_p, w_r_p, b_p, tile,
                         apply_relu=not last, out_dtype=out_dtype)
        # TODO(synk): F.dropout is identity in inference mode (training=False);
        # training-mode dropout would need pltpu.prng_random_bits in-kernel.
    return x_p[:n, :f_out_final]


def init_sage_params(key, in_channels, hidden_channels, out_channels, num_layers):
    """Deterministic glorot-style init matching SAGEConv's parameter shapes."""
    dims = [in_channels] + [hidden_channels] * (num_layers - 1) + [out_channels]
    params = []
    for li in range(num_layers):
        f_in, f_out = dims[li], dims[li + 1]
        key, k1, k2, k3 = jax.random.split(key, 4)
        scale = (6.0 / (f_in + f_out)) ** 0.5
        # stored pre-transposed: [f_in, f_out] so the kernel right-multiplies
        w_l = jax.random.uniform(k1, (f_in, f_out), jnp.float32, -scale, scale)
        w_r = jax.random.uniform(k2, (f_in, f_out), jnp.float32, -scale, scale)
        b = jax.random.uniform(k3, (1, f_out), jnp.float32, -0.1, 0.1)
        params.append((w_l, w_r, b))
    return params


def sage_reference(x, adj, params):
    """Pure-JAX reference with the same bf16 input quantization as the kernels."""
    a = adj.astype(jnp.float32)
    deg = jnp.maximum(a.sum(axis=1, keepdims=True), 1.0)
    h = x.astype(jnp.bfloat16).astype(jnp.float32)
    for li, (w_l, w_r, b) in enumerate(params):
        wl = w_l.astype(jnp.bfloat16).astype(jnp.float32)
        wr = w_r.astype(jnp.bfloat16).astype(jnp.float32)
        agg = (a @ h) / deg
        out = agg @ wl + h @ wr + jnp.reshape(b, (1, -1))
        if li != len(params) - 1:
            out = jnp.maximum(out, 0.0)
            h = out.astype(jnp.bfloat16).astype(jnp.float32)
        else:
            h = out
    return h


if __name__ == "__main__":
    # Shapes consistent with SAGE(in, hidden, out, num_layers): N nodes,
    # feature dims in->hidden->hidden->out.  Big enough to exercise a real
    # (2x2) aggregation grid and both layer orderings.
    N = 512
    in_channels, hidden_channels, out_channels = 64, 256, 32
    num_layers, dropout = 3, 0.5

    key = jax.random.PRNGKey(0)
    kx, kadj, kp = jax.random.split(key, 3)

    x = jax.random.normal(kx, (N, in_channels), jnp.float32)
    # Random sparse-ish binary adjacency (dense representation of adj_t).
    adj = (jax.random.uniform(kadj, (N, N)) < 0.1).astype(jnp.float32)

    params = init_sage_params(kp, in_channels, hidden_channels, out_channels,
                              num_layers)

    adj_p, inv_deg, tile = prepare_graph(adj)   # hoisted, reusable graph prep
    out = sage_forward(x, adj_p, inv_deg, tile, params,
                       dropout=dropout, training=False)
    out = jax.block_until_ready(out)
    assert out.shape == (N, out_channels), out.shape

    ref = sage_reference(x, adj, params)
    err = float(jnp.max(jnp.abs(out - ref)))
    scale = float(jnp.max(jnp.abs(ref))) + 1e-6
    assert err <= 5e-2 * scale + 5e-2, (err, scale)

    print("KERNEL_OK")
</pallas_src>

<mosaic_0001>
module attributes {stable_mosaic.version = 11 : i64} {
  func.func @aggregate_kernel(%arg0: i32, %arg1: i32, %arg2: memref<256x256xi8, #tpu.memory_space<vmem>>, %arg3: memref<512x128xbf16, #tpu.memory_space<vmem>>, %arg4: memref<256x1xf32, #tpu.memory_space<vmem>>, %arg5: memref<256x128xbf16, #tpu.memory_space<vmem>>, %arg6: memref<256x128xf32, #tpu.memory_space<vmem>>) attributes {dimension_semantics = [#tpu.dimension_semantics<parallel>, #tpu.dimension_semantics<arbitrary>], iteration_bounds = array<i64: 2, 2>, scalar_prefetch = 0 : i64, scratch_operands = 1 : i64, tpu.core_type = #tpu.core_type<tc>, window_params = [{transform_indices = @transform_0, window_bounds = array<i64: 256, 256>}, {pipeline_mode = #tpu.pipeline_mode<synchronous>, transform_indices = @transform_1, window_bounds = array<i64: 512, 128>}, {transform_indices = @transform_2, window_bounds = array<i64: 256, 1>}, {transform_indices = @transform_3, window_bounds = array<i64: 256, 128>}]} {
    %c0_i32 = arith.constant 0 : i32
    %0 = arith.cmpi eq, %arg1, %c0_i32 : i32
    %1 = arith.extui %0 : i1 to i32
    %c0_i32_0 = arith.constant 0 : i32
    %2 = arith.cmpi ne, %1, %c0_i32_0 : i32
    scf.if %2 {
      %cst_8 = arith.constant 0.000000e+00 : f32
      %17 = vector.broadcast %cst_8 : f32 to vector<256x128xf32>
      %c0_9 = arith.constant 0 : index
      %c0_10 = arith.constant 0 : index
      %18 = vector.load %arg6[%c0_9, %c0_10] : memref<256x128xf32, #tpu.memory_space<vmem>>, vector<256x128xf32>
      tpu.vector_store %arg6[%c0_9, %c0_10], %17 {strides = array<i32>} : memref<256x128xf32, #tpu.memory_space<vmem>>, vector<256x128xf32>,
    } else {
    }
    %c0 = arith.constant 0 : index
    %c0_1 = arith.constant 0 : index
    %3 = vector.load %arg2[%c0, %c0_1] : memref<256x256xi8, #tpu.memory_space<vmem>>, vector<256x256xi8>
    %4 = arith.sitofp %3 : vector<256x256xi8> to vector<256x256xf32>
    %5 = arith.truncf %4 : vector<256x256xf32> to vector<256x256xbf16>
    %c256_i32 = arith.constant 256 : i32
    %6 = arith.muli %arg1, %c256_i32 : i32
    %7 = tpu.assume_multiple %6, 256 : i32
    %8 = arith.index_cast %7 : i32 to index
    %c0_2 = arith.constant 0 : index
    %9 = vector.load %arg3[%8, %c0_2] : memref<512x128xbf16, #tpu.memory_space<vmem>>, vector<256x128xbf16>
    %c0_3 = arith.constant 0 : index
    %c0_4 = arith.constant 0 : index
    %10 = vector.load %arg6[%c0_3, %c0_4] : memref<256x128xf32, #tpu.memory_space<vmem>>, vector<256x128xf32>
    %cst = arith.constant dense<0.000000e+00> : vector<256x128xf32>
    %11 = tpu.matmul %5, %9, %cst {dimension_numbers = #tpu.dot_dimension_numbers<[1], [0], [0], [1], [0, 0, 1, 1], [], []>} : vector<256x256xbf16>, vector<256x128xbf16>, vector<256x128xf32> -> vector<256x128xf32>
    %12 = arith.addf %10, %11 : vector<256x128xf32>
    %c0_5 = arith.constant 0 : index
    %c0_6 = arith.constant 0 : index
    %13 = vector.load %arg6[%c0_5, %c0_6] : memref<256x128xf32, #tpu.memory_space<vmem>>, vector<256x128xf32>
    tpu.vector_store %arg6[%c0_5, %c0_6], %12 {strides = array<i32>} : memref<256x128xf32, #tpu.memory_space<vmem>>, vector<256x128xf32>,
    %c1_i32 = arith.constant 1 : i32
    %14 = arith.cmpi eq, %arg1, %c1_i32 : i32
    %15 = arith.extui %14 : i1 to i32
    %c0_i32_7 = arith.constant 0 : i32
    %16 = arith.cmpi ne, %15, %c0_i32_7 : i32
    scf.if %16 {
      %c0_8 = arith.constant 0 : index
      %c0_9 = arith.constant 0 : index
      %17 = vector.load %arg6[%c0_8, %c0_9] : memref<256x128xf32, #tpu.memory_space<vmem>>, vector<256x128xf32>
      %c0_10 = arith.constant 0 : index
      %c0_11 = arith.constant 0 : index
      %18 = vector.load %arg4[%c0_10, %c0_11] : memref<256x1xf32, #tpu.memory_space<vmem>>, vector<256x1xf32>
      %19 = vector.broadcast %18 : vector<256x1xf32> to vector<256x128xf32>
      %20 = arith.mulf %17, %19 : vector<256x128xf32>
      %21 = arith.truncf %20 : vector<256x128xf32> to vector<256x128xbf16>
      %c0_12 = arith.constant 0 : index
      %c0_13 = arith.constant 0 : index
      %22 = vector.load %arg5[%c0_12, %c0_13] : memref<256x128xbf16, #tpu.memory_space<vmem>>, vector<256x128xbf16>
      tpu.vector_store %arg5[%c0_12, %c0_13], %21 {strides = array<i32>} : memref<256x128xbf16, #tpu.memory_space<vmem>>, vector<256x128xbf16>,
    } else {
    }
    return
  }
  func.func @transform_0(%arg0: i32, %arg1: i32) -> (i32, i32) {
    %c0_i32 = arith.constant 0 : i32
    return %arg0, %arg1 : i32, i32
  }
  func.func @transform_1(%arg0: i32, %arg1: i32) -> (i32, i32) {
    %c0_i32 = arith.constant 0 : i32
    %c0_i32_0 = arith.constant 0 : i32
    %c0_i32_1 = arith.constant 0 : i32
    return %c0_i32, %c0_i32_0 : i32, i32
  }
  func.func @transform_2(%arg0: i32, %arg1: i32) -> (i32, i32) {
    %c0_i32 = arith.constant 0 : i32
    %c0_i32_0 = arith.constant 0 : i32
    return %arg0, %c0_i32 : i32, i32
  }
  func.func @transform_3(%arg0: i32, %arg1: i32) -> (i32, i32) {
    %c0_i32 = arith.constant 0 : i32
    %c0_i32_0 = arith.constant 0 : i32
    return %arg0, %c0_i32 : i32, i32
  }
}

</mosaic_0001>

<bundles_post_ra>
// kernel: tpu_custom_call.1
= control target key start
LH: loop header
LB: loop body
LE: loop exit
PB: predicated region body
PF: predicated region fallthrough
CT: control target
= control target key end

     0   :  { %s2474_s0 = inlined_call_operand.hbm [shape: s8[512,512], index: 0, kind: input, shape index: {}]   ;;  %s2475_s1 = inlined_call_operand.hbm [shape: bf16[512,128], index: 1, kind: input, shape index: {}]   ;;  %s2476_s2 = inlined_call_operand.hbm [shape: f32[512,1], index: 2, kind: input, shape index: {}]   ;;  %s2477_s3 = inlined_call_operand.hbm [shape: bf16[512,128], index: 3, kind: output, shape index: {}]  }
   0x1   :  { %2488 = sst [smem:[#allocation19_spill]] %s2474_s0 }
   0x2   :  { %2489 = sst [smem:[#allocation20_spill]] %s2477_s3 }
   0x3   :  { %8 = vsyncpa [#allocation4], 0 }
   0x4   :  { %10 = vsyncpa [#allocation4 + $0x1], 0 }
   0x5   :  { %11 = vsyncpa [#allocation7], 0 }
   0x6   :  { %12 = vsyncpa [#allocation5], 0 }
   0x7   :  { %14 = vsyncpa [#allocation5 + $0x1], 0  ;;  %s2025_s12 = smov 0   ;;  %s2027_s13 = smov 0  }
   0x8   :  { %s2029_s14 = smov 0   ;;  %s2031_s15 = smov 0  }
   0x9   :  { %s2033_s16 = smov 0   ;;  %s2035_s17 = smov 0  }
   0xa   :  { %s2037_s18 = smov 0   ;;  %s2039_s19 = smov 0  }
   0xb   :  { %s2041_s20 = smov 0   ;;  %s2043_s21 = smov 0  }
   0xc   :  { %s2045_s22 = smov 0  }
   0xd LB: > { %2490 = sst [smem:[#allocation14_spill]] %s1976_s19  ;;  %s29_s23 = sadd.s32 1, %s1980_s20  ;;  %s1988_s22 = sphi %s2045_s22, %s20_s22   ;;  %s1984_s21 = sphi %s2043_s21, %s2532_s21   ;;  %s1980_s20 = sphi %s2041_s20, %s2523_s20   ;;  %s1976_s19 = sphi %s2039_s19, %s2531_s19   ;;  %s1972_s18 = sphi %s2037_s18, %s2522_s18   ;;  %s1968_s17 = sphi %s2035_s17, %s2530_s17   ;;  %s1964_s16 = sphi %s2033_s16, %s2529_s16   ;;  %s1960_s15 = sphi %s2031_s15, %s2528_s15   ;;  %s1956_s14 = sphi %s2029_s14, %s2527_s14   ;;  %s1952_s13 = sphi %s2027_s13, %s2526_s13   ;;  %s1948_s12 = sphi %s2025_s12, %s2525_s12  }
   0xe   : > { %2491 = sst [smem:[#allocation15_spill]] %s1980_s20  ;;  %s32_s24 = sadd.s32 1, %s1984_s21 }
   0xf   : > { %p30_p0 = scmp.ge.s32.totalorder %s29_s23, 2  ;;  %s41_s25 = sadd.s32 1, %s1968_s17 }
  0x10   : > { %p48_p1 = scmp.ne.s32.totalorder %s1968_s17, %s1964_s16  ;;  %p2482_p2 = scmp.eq.s32.totalorder %s1988_s22, 0 }
  0x11   : > { %s2534_s23 = smov (%p30_p0, %s29_s23), 0  ;;  %s2536_s24 = smov (!%p30_p0, %s32_s24), %s1984_s21 }
  0x12   : > { %2492 = sst [smem:[#allocation16_spill]] %s2534_s23  ;;  %s37_s26 = ssub.s32 %s1980_s20, %s2534_s23 }
  0x13   : > { %p2093_p3 = por %p2482_p2, %p48_p1  ;;  %p34_p4 = scmp.ge.s32.totalorder %s2536_s24, 2 }
  0x14   : > { %p2481_p5 = scmp.lt.s32.totalorder %s1988_s22, 4  ;;  %s164_s28 = sand.u32 1, %s1988_s22  }
  0x15   : > { %s2538_s24 = smov (%p34_p4, %s2536_s24), 0  ;;  %s166_s29 = sand.u32 1, %s1968_s17  }
  0x16   : > { %2494 = sst [smem:[#allocation17_spill]] %s2538_s24  ;;  %s2104_s30 = ssub.s32 %s1984_s21, %s2538_s24 }
  0x17   : > { %s1295_s4 = sshll.u32 %s166_s29, 7  ;;  %s38_s5 = sor.u32 %s37_s26, %s2104_s30 }
  0x18   : > { %p39_p7 = scmp.eq.s32.totalorder %s38_s5, 0  ;;  %s1297_s6 = sshll.u32 %s1980_s20, 1 }
  0x19   : > { %s1365_s7 = sshll.u32 %s1984_s21, 5  ;;  %s168_s10 = scalar_lea.vmem [#allocation3], %s1295_s4 }
  0x1a   : > { %s2111_s8 = scalar_select %p39_p7, %s1968_s17, %s41_s25  }
  0x1b   : > { %s175_s9 = sadd.s32 %s1365_s7, %s1297_s6  ;;  %s178_s11 = sshll.u32 %s168_s10, 4  ;;  %s2113_s11 = int_to_ptr.vmem [resolvable:$true] %s178_s11 }
  0x1c   : > { %2495 = sst [smem:[#allocation18_spill]] %s2111_s8  ;;  %s1299_s23 = sshll.u32 %s175_s9, 7 }
  0x1d   : > { %s2496_s0 = sld [smem:[#allocation19_spill]]  ;;  %p2124_p8 = pnand %p2481_p5, %p2093_p3 }
  0x1e   : > { %s2128_s26 = scalar_lea.sflag [#allocation4], %s164_s28 }
  0x1f   : > { %p1772_p10 = pneg %p2124_p8 }
  0x23   : > { %s2118_s24 = scalar_lea.hbm %s2496_s0, %s1299_s23  ;;  %s1775_s23 = scalar_lea.hbm %s2496_s0, 8192 }
  0x24   : > { %s1770_s29 = scalar_lea.hbm %s2118_s24, 2048  ;;  %p1776_p13 = scmp.lt.u32.totalorder %s2118_s24, %s2496_s0 }
  0x25   : > { %p1771_p9 = scmp.ne.s32.totalorder %s2118_s24, %s1770_s29  ;;  %p1777_p0 = scmp.lt.u32.totalorder %s1775_s23, %s1770_s29 }
  0x26   : > { %p1779_p3 = scmp.lt.u32.totalorder %s1770_s29, %s2118_s24 }
  0x27   : > { %p1773_p11 = pnand %p1772_p10, %p1771_p9  ;;  %p1778_p1 = por %p1777_p0, %p1776_p13 }
  0x29   : > { %p1774_p12 = pneg %p1773_p11  ;;  %p1780_p4 = por %p1779_p3, %p1778_p1 }
  0x2b   : > { %p1781_p7 = pnand %p1780_p4, %p1774_p12 }
  0x2d   : > { %1784 = shalt.err (!%p1781_p7)
}
  0x2e   : > { %s1785_s28 = scalar_lea.vmem %s2113_s11, 2048  ;;  %s1990_s5 = smov [#allocation3]  }
  0x2f   : > { %p1786_p9 = scmp.ne.s32.totalorder %s2113_s11, %s1785_s28  ;;  %s1790_s6 = sshll.u32 %s1990_s5, 4  ;;  %s1791_s6 = int_to_ptr.vmem [resolvable:$false] %s1790_s6 }
  0x30   : > { %s1792_s7 = scalar_lea.vmem %s1791_s6, 4096  ;;  %p1793_p2 = scmp.lt.s32.totalorder %s2113_s11, %s1791_s6 }
  0x31   : > { %p1788_p11 = pnand %p1786_p9, %p1772_p10  ;;  %p1794_p13 = scmp.lt.s32.totalorder %s1792_s7, %s1785_s28 }
  0x33   : > { %p1789_p5 = pneg %p1788_p11  ;;  %p1795_p0 = por %p1794_p13, %p1793_p2 }
  0x35   : > { %p1796_p1 = pnand %p1795_p0, %p1789_p5 }
  0x37   : > { %1799 = shalt.err (!%p1796_p1)
}
  0x38   : > { %s1991_s9 = smov 512   ;;  %s1992_s10 = smov 256  }
  0x39   : > { %s1993_s29 = smov 16   ;;  %s2157_s3 = sadd.s32 4294967295, %s1988_s22  }
  0x3a   : > { %1640 = dma.hbm_to_vmem [thread:$0]  (!%p2124_p8), %s2118_s24, 2048, %s2113_s11, %s2128_s26, %s1991_s9, %s1992_s10, %s1993_s29  }
  0x3b   : > { %s1291_s19 = sadd.s32 4294967294, %s1988_s22   ;;  %p54_p2 = scmp.ne.s32.totalorder %s1964_s16, %s1960_s15 }
  0x3c   : > { %p2483_p5 = scmp.eq.s32.totalorder %s2157_s3, 0  ;;  %p101_p10 = scmp.ne.s32.totalorder %s1952_s13, %s1948_s12 }
  0x3d   : > { %p131_p8 = scmp.eq.s32.totalorder %s1291_s19, 3  ;;  %p1292_p7 = scmp.ge.s32.totalorder %s1988_s22, 1 }
  0x3e   : > { %p2168_p3 = por %p2483_p5, %p54_p2  ;;  %p2174_p4 = por %p101_p10, %p2483_p5 }
  0x3f   : > { %p2179_p9 = por %p131_p8, %p101_p10  ;;  %p138_p11 = scmp.lt.s32.totalorder %s1988_s22, 5 }
  0x40   : > { %s2498_s24 = scalar_select %p2168_p3, 1, 0 }
  0x41   : > { %s2499_s11 = scalar_select %p2174_p4, 1, 0 }
  0x42   : > { %s2500_s15 = scalar_select %p2179_p9, 1, 0 }
  0x43   : > { %p2184_p13 = pnand %p1292_p7, %p138_p11  ;;  %s1994_s23 = smov [#allocation6]  }
  0x44   : > { %s150_s27 = sshll.u32 %s1994_s23, 4  ;;  %s88_s5 = sadd.s32 1, %s1956_s14  ;;  %s2188_s27 = int_to_ptr.vmem [resolvable:$true] %s150_s27 }
  0x45   : > { %s2501_s25 = scalar_select %p2184_p13, 1, 0 }
  0x46   : > { %p1633_p0 = pneg %p2184_p13  ;;  %s190_s6 = sand.u32 1, %s1956_s14  }
  0x47   : > { %s1800_s10 = scalar_lea.hbm %s2475_s1, 4096 }
  0x48   : > { %p2195_p1 = pnand %p1633_p0, %p2483_p5  ;;  %p1801_p10 = scmp.ne.s32.totalorder %s2475_s1, %s1800_s10 }
  0x49   : > { %p1807_p0 = scmp.lt.u32.totalorder %s1800_s10, %s2475_s1 }
  0x4a   : > { %p1802_p8 = pneg %p2195_p1 }
  0x4c   : > { %p1803_p7 = pnand %p1802_p8, %p1801_p10 }
  0x4e   : > { %p1804_p11 = pneg %p1803_p7 }
  0x50   : > { %p1809_p5 = pnand %p1807_p0, %p1804_p11 }
  0x52   : > { %1812 = shalt.err (!%p1809_p5)
}
  0x53   : > { %s1813_s0 = scalar_lea.vmem %s2188_s27, 4096  ;;  %p1821_p9 = scmp.lt.s32.totalorder %s2188_s27, %s2188_s27 }
  0x54   : > { %p1814_p12 = scmp.ne.s32.totalorder %s2188_s27, %s1813_s0  ;;  %p1822_p4 = scmp.lt.s32.totalorder %s1813_s0, %s1813_s0 }
  0x56   : > { %p1816_p2 = pnand %p1814_p12, %p1802_p8  ;;  %p1823_p3 = por %p1822_p4, %p1821_p9 }
  0x58   : > { %p1817_p6 = pneg %p1816_p2 }
  0x5a   : > { %p1824_p13 = pnand %p1823_p3, %p1817_p6 }
  0x5c   : > { %1827 = shalt.err (!%p1824_p13)
}
  0x5d   : > { %s1995_s7 = smov 64   ;;  %s1996_s4 = smov 4  }
  0x5e   : > { %1636 = dma.hbm_to_vmem [thread:$0]  (!%p2195_p1), %s2475_s1, 4096, %s2188_s27, [#allocation7], %s1995_s7, %s1995_s7, %s1996_s4  }
  0x5f   : > { %p2503_p6 = scmp.eq.s32.totalorder %s2104_s30, 0  ;;  %p2504_p5 = scmp.eq.s32.totalorder %s1988_s22, 0 }
  0x60   : > { %p2505_p12 = scmp.ne.s32.totalorder %s1956_s14, %s1952_s13  ;;  %p2507_p9 = scmp.eq.s32.totalorder %s2157_s3, 3 }
  0x61   : > { %s2227_s10 = scalar_select %p2503_p6, %s1956_s14, %s88_s5  }
  0x62   : > { %p97_p3 = por %p2505_p12, %p2504_p5  ;;  %p2506_p4 = pmov %p2505_p12 }
  0x63   : > { %s1300_s19 = sshll.u32 %s190_s6, 8  ;;  %s2509_s23 = sshll.u32 %s1984_s21, 12 }
  0x64   : > { %p2239_p13 = por %p2507_p9, %p2506_p4  ;;  %s2248_s8 = scalar_lea.hbm %s2476_s2, %s2509_s23 }
  0x65   : > { %p2510_p1 = scmp.lt.s32.totalorder %s1988_s22, 4  ;;  %s192_s27 = scalar_lea.vmem [#allocation8], %s1300_s19 }
  0x66   : > { %s199_s5 = sshll.u32 %s192_s27, 4  ;;  %s1828_s6 = scalar_lea.hbm %s2248_s8, 4096  ;;  %s2256_s5 = int_to_ptr.vmem [resolvable:$true] %s199_s5 }
  0x67   : > { %p2252_p2 = pnand %p2510_p1, %p97_p3  ;;  %p1829_p10 = scmp.ne.s32.totalorder %s2248_s8, %s1828_s6 }
  0x68   : > { %s1833_s4 = scalar_lea.hbm %s2476_s2, 8192  ;;  %p1834_p0 = scmp.lt.u32.totalorder %s2248_s8, %s2476_s2 }
  0x69   : > { %p1830_p8 = pneg %p2252_p2  ;;  %p1835_p6 = scmp.lt.u32.totalorder %s1833_s4, %s1828_s6 }
  0x6a   : > { %p1837_p12 = scmp.lt.u32.totalorder %s1828_s6, %s2248_s8 }
  0x6b   : > { %p1831_p7 = pnand %p1830_p8, %p1829_p10  ;;  %p1836_p5 = por %p1835_p6, %p1834_p0 }
  0x6d   : > { %p1832_p11 = pneg %p1831_p7  ;;  %p1838_p3 = por %p1837_p12, %p1836_p5 }
  0x6f   : > { %p1839_p4 = pnand %p1838_p3, %p1832_p11 }
  0x71   : > { %1842 = shalt.err (!%p1839_p4)
}
  0x72   : > { %s1843_s19 = scalar_lea.vmem %s2256_s5, 4096  ;;  %s1997_s23 = smov [#allocation8]  }
  0x73   : > { %p1844_p9 = scmp.ne.s32.totalorder %s2256_s5, %s1843_s19  ;;  %s1848_s28 = sshll.u32 %s1997_s23, 4  ;;  %s1849_s28 = int_to_ptr.vmem [resolvable:$false] %s1848_s28 }
  0x74   : > { %s1850_s27 = scalar_lea.vmem %s1849_s28, 8192  ;;  %p1851_p7 = scmp.lt.s32.totalorder %s2256_s5, %s1849_s28 }
  0x75   : > { %p1846_p1 = pnand %p1844_p9, %p1830_p8  ;;  %p1852_p0 = scmp.lt.s32.totalorder %s1850_s27, %s1843_s19 }
  0x77   : > { %p1847_p10 = pneg %p1846_p1  ;;  %p1853_p6 = por %p1852_p0, %p1851_p7 }
  0x79   : > { %p1854_p5 = pnand %p1853_p6, %p1847_p10 }
  0x7b   : > { %1857 = shalt.err (!%p1854_p5)
}
  0x7c   : > { %s1998_s6 = smov 128   ;;  %s1999_s20 = smov 8  }
  0x7d   : > { %1643 = dma.hbm_to_vmem [thread:$0]  (!%p2252_p2), %s2248_s8, 4096, %s2256_s5, %s2128_s26, %s1998_s6, %s1998_s6, %s1999_s20  }
  0x7e   : > { %p2512_p8 = scmp.ne.s32.totalorder %s2501_s25, 0 }
  0x7f   : > { %s213_s7 = sand.u32 (!%p2512_p8), 1, %s2157_s3   ;;  %s215_s4 = sand.u32 (!%p2512_p8), 1, %s1964_s16  }
  0x80   : > { %211 = sbr.rel (%p2512_p8) target bundleno = 670 (0x29e), region = 32  ;;  %s1304_s9 = sshll.u32 (!%p2512_p8), %s215_s4, 7 }
  0x81   : > { %s214_s0 = scalar_lea.sflag (!%p2512_p8), [#allocation4], %s213_s7  ;;  %s2288_s19 = scalar_lea.vmem (!%p2512_p8), [#allocation3], %s1304_s9 }
  0x82   : > { %p2513_p11 = scmp.ne.s32.totalorder (!%p2512_p8), %s2498_s24, 0 }
  0x87   : > { %1931 = dma.done.wait (%p2513_p11), %s214_s0, 2048  }
  0x88   : > { %1933 = vsyncadd (%p2513_p11), %s214_s0, 4294965248  ;;  %p2514_p12 = scmp.eq.s32.totalorder %s2157_s3, 0 }
  0x8a   : > { %1935 = dma.done.wait (%p2514_p12), [#allocation7], 4096   ;;  %p2515_p2 = pmov %p2514_p12 }
  0x8b   : > { %s2299_s8 = sand.u32 1, %s1952_s13   ;;  %p2516_p3 = scmp.ne.s32.totalorder %s2499_s11, 0 }
  0x8c   : > { %1937 = vsyncadd (%p2515_p2), [#allocation7], 4294963200  ;;  %s1306_s26 = sshll.u32 %s2299_s8, 8 }
  0x8d   : > { %s2302_s25 = scalar_lea.vmem [#allocation8], %s1306_s26 }
  0x8e   : > { %1939 = dma.done.wait (%p2516_p3), %s214_s0, 4096  }
  0x8f   : > { %1941 = vsyncadd (%p2516_p3), %s214_s0, 4294963200  ;;  %s1307_s24 = sshll.u32 %s2299_s8, 7  ;;  %p1308_p4 = scmp.ne.s32.totalorder %s1972_s18, 0 }
  0x90   : > { %s2309_s30 = scalar_lea.vmem [#allocation9], %s1307_s24  ;;  %v2000_v0 = vmov (!%p1308_p4), 0.0  }
  0x91   : > { %266 = sbr.rel (%p1308_p4) target bundleno = 161 (0xa1), region = 48  ;;  %267 = vst [vmem:[#allocation2] sm:$0xff] (!%p1308_p4), %v2000_v0  ;;  %268 = vst [vmem:[#allocation2 + $0x8] sm:$0xff] (!%p1308_p4), %v2000_v0 }
  0x92   : > { %269 = vst [vmem:[#allocation2 + $0x10] sm:$0xff] (!%p1308_p4), %v2000_v0  ;;  %270 = vst [vmem:[#allocation2 + $0x18] sm:$0xff] (!%p1308_p4), %v2000_v0 }
  0x93   : > { %271 = vst [vmem:[#allocation2 + $0x20] sm:$0xff] (!%p1308_p4), %v2000_v0  ;;  %272 = vst [vmem:[#allocation2 + $0x28] sm:$0xff] (!%p1308_p4), %v2000_v0 }
  0x94   : > { %273 = vst [vmem:[#allocation2 + $0x30] sm:$0xff] (!%p1308_p4), %v2000_v0  ;;  %274 = vst [vmem:[#allocation2 + $0x38] sm:$0xff] (!%p1308_p4), %v2000_v0 }
  0x95   : > { %275 = vst [vmem:[#allocation2 + $0x40] sm:$0xff] (!%p1308_p4), %v2000_v0  ;;  %276 = vst [vmem:[#allocation2 + $0x48] sm:$0xff] (!%p1308_p4), %v2000_v0 }
  0x96   : > { %277 = vst [vmem:[#allocation2 + $0x50] sm:$0xff] (!%p1308_p4), %v2000_v0  ;;  %278 = vst [vmem:[#allocation2 + $0x58] sm:$0xff] (!%p1308_p4), %v2000_v0 }
  0x97   : > { %279 = vst [vmem:[#allocation2 + $0x60] sm:$0xff] (!%p1308_p4), %v2000_v0  ;;  %280 = vst [vmem:[#allocation2 + $0x68] sm:$0xff] (!%p1308_p4), %v2000_v0 }
  0x98   : > { %281 = vst [vmem:[#allocation2 + $0x70] sm:$0xff] %v2000_v0  ;;  %282 = vst [vmem:[#allocation2 + $0x78] sm:$0xff] %v2000_v0 }
  0x99   : > { %283 = vst [vmem:[#allocation2 + $0x80] sm:$0xff] %v2000_v0  ;;  %284 = vst [vmem:[#allocation2 + $0x88] sm:$0xff] %v2000_v0 }
  0x9a   : > { %285 = vst [vmem:[#allocation2 + $0x90] sm:$0xff] %v2000_v0  ;;  %286 = vst [vmem:[#allocation2 + $0x98] sm:$0xff] %v2000_v0 }
  0x9b   : > { %287 = vst [vmem:[#allocation2 + $0xa0] sm:$0xff] %v2000_v0  ;;  %288 = vst [vmem:[#allocation2 + $0xa8] sm:$0xff] %v2000_v0 }
  0x9c   : > { %289 = vst [vmem:[#allocation2 + $0xb0] sm:$0xff] %v2000_v0  ;;  %290 = vst [vmem:[#allocation2 + $0xb8] sm:$0xff] %v2000_v0 }
  0x9d   : > { %291 = vst [vmem:[#allocation2 + $0xc0] sm:$0xff] %v2000_v0  ;;  %292 = vst [vmem:[#allocation2 + $0xc8] sm:$0xff] %v2000_v0 }
  0x9e   : > { %293 = vst [vmem:[#allocation2 + $0xd0] sm:$0xff] %v2000_v0  ;;  %294 = vst [vmem:[#allocation2 + $0xd8] sm:$0xff] %v2000_v0 }
  0x9f   : > { %295 = vst [vmem:[#allocation2 + $0xe0] sm:$0xff] %v2000_v0  ;;  %296 = vst [vmem:[#allocation2 + $0xe8] sm:$0xff] %v2000_v0 }
  0xa0   : > { %297 = vst [vmem:[#allocation2 + $0xf0] sm:$0xff] %v2000_v0  ;;  %298 = vst [vmem:[#allocation2 + $0xf8] sm:$0xff] %v2000_v0 }
  0xa1 PF: > { %s1309_s3 = sshll.u32 %s1972_s18, 8  ;;  %v2314_v1 = vld [vmem:[%s2288_s19 + $0x8] sm:$0xff]  ;;  %v299_v21 = vld [vmem:[%s2288_s19] sm:$0xff]  ;;  %v302_v27 = vld [vmem:[%s2288_s19 + $0x18] sm:$0xff]  ;;  %p1327_p9 = scmp.ne.s32.totalorder %s1972_s18, 1 }
  0xa2   : > { %v2317_v2 = vld [vmem:[%s2288_s19 + $0x48] sm:$0xff]  ;;  %s348_s11 = sshra.s32 %s1309_s3, 3  ;;  %v316_v3 = vunpack.c.l.s8.bf16 %v2314_v1  ;;  %v307_v22 = vld [vmem:[%s2288_s19 + $0x40] sm:$0xff]  ;;  %v315_v23 = vunpack.c.l.s8.bf16 %v299_v21  ;;  %v318_v25 = vunpack.c.h.s8.bf16 %v2314_v1  ;;  %v310_v28 = vld [vmem:[%s2288_s19 + $0x58] sm:$0xff]  ;;  %v317_v29 = vunpack.c.h.s8.bf16 %v299_v21 }
  0xa3   : > { %v332_v4 = vunpack.c.l.s8.bf16 %v2317_v2  ;;  %s1310_s5 = sshll.u32 %s348_s11, 2  ;;  %v331_v24 = vunpack.c.l.s8.bf16 %v307_v22  ;;  %v334_v26 = vunpack.c.h.s8.bf16 %v2317_v2  ;;  %v333_v30 = vunpack.c.h.s8.bf16 %v307_v22  ;;  %v301_v33 = vld [vmem:[%s2288_s19 + $0x10] sm:$0xff]  ;;  %v304_v39 = vld [vmem:[%s2288_s19 + $0x28] sm:$0xff]  ;;  %v303_v45 = vld [vmem:[%s2288_s19 + $0x20] sm:$0xff] }
  0xa4   : > { %544 = vmatprep.mubr.bf16.mxu0 %v316_v3  ;;  %s2321_s23 = scalar_lea.vmem [#allocation6], %s1310_s5  ;;  %v320_v31 = vunpack.c.l.s8.bf16 %v302_v27  ;;  %v336_v32 = vunpack.c.l.s8.bf16 %v310_v28  ;;  %v309_v34 = vld [vmem:[%s2288_s19 + $0x50] sm:$0xff]  ;;  %v319_v35 = vunpack.c.l.s8.bf16 %v301_v33  ;;  %v322_v37 = vunpack.c.h.s8.bf16 %v302_v27  ;;  %v312_v40 = vld [vmem:[%s2288_s19 + $0x68] sm:$0xff]  ;;  %v311_v46 = vld [vmem:[%s2288_s19 + $0x60] sm:$0xff] }
  0xa5   : > { %608 = vmatprep.mubr.bf16.mxu1 %v332_v4  ;;  %v1752_v5 = vld [vmem:[%s2321_s23 + $0x40] sm:$0xff]   ;;  %v1754_v7 = vld [vmem:[%s2321_s23 + $0x48] sm:$0xff]   ;;  %v1756_v9 = vld [vmem:[%s2321_s23 + $0x50] sm:$0xff]   ;;  %v335_v36 = vunpack.c.l.s8.bf16 %v309_v34  ;;  %v338_v38 = vunpack.c.h.s8.bf16 %v310_v28  ;;  %v321_v41 = vunpack.c.h.s8.bf16 %v301_v33  ;;  %v337_v42 = vunpack.c.h.s8.bf16 %v309_v34 }
  0xa6   : > { %v1753_v6 = vld [vmem:[%s2321_s23] sm:$0xff]   ;;  %1495 = vmatprep.subr.bf16.mxu0 %v1752_v5  ;;  %1607 = vmatprep.subr.bf16.mxu1 %v1752_v5  ;;  %v1755_v8 = vld [vmem:[%s2321_s23 + $0x8] sm:$0xff]   ;;  %v1757_v10 = vld [vmem:[%s2321_s23 + $0x10] sm:$0xff]   ;;  %v324_v43 = vunpack.c.l.s8.bf16 %v304_v39  ;;  %v340_v44 = vunpack.c.l.s8.bf16 %v312_v40  ;;  %v323_v47 = vunpack.c.l.s8.bf16 %v303_v45  ;;  %v339_v48 = vunpack.c.l.s8.bf16 %v311_v46 }
  0xa7   : > { %1496 = vmatpush3.bf16.msra.mxu0 %v1753_v6  ;;  %1615 = vmatpush3.bf16.msra.mxu1 %v1753_v6  ;;  %v1758_v11 = vld [vmem:[%s2321_s23 + $0x58] sm:$0xff]   ;;  %v1760_v13 = vld [vmem:[%s2321_s23 + $0x60] sm:$0xff]   ;;  %v1762_v15 = vld [vmem:[%s2321_s23 + $0x68] sm:$0xff]   ;;  %v326_v49 = vunpack.c.h.s8.bf16 %v304_v39  ;;  %v342_v50 = vunpack.c.h.s8.bf16 %v312_v40  ;;  %v325_v53 = vunpack.c.h.s8.bf16 %v303_v45  ;;  %v341_v54 = vunpack.c.h.s8.bf16 %v311_v46 }
  0xa8   : > { %1497 = vmatprep.subr.bf16.mxu0 %v1754_v7  ;;  %1608 = vmatprep.subr.bf16.mxu1 %v1754_v7  ;;  %v1759_v12 = vld [vmem:[%s2321_s23 + $0x18] sm:$0xff]   ;;  %v1761_v14 = vld [vmem:[%s2321_s23 + $0x20] sm:$0xff]   ;;  %v1763_v16 = vld [vmem:[%s2321_s23 + $0x28] sm:$0xff]  }
  0xa9   : > { %v1764_v17 = vld [vmem:[%s2321_s23 + $0x70] sm:$0xff]   ;;  %v1766_v19 = vld [vmem:[%s2321_s23 + $0x78] sm:$0xff]   ;;  %v384_v3 = vld [vmem:[#allocation2] sm:$0xff] }
  0xaa   : > { %v1765_v18 = vld [vmem:[%s2321_s23 + $0x30] sm:$0xff]   ;;  %v1767_v20 = vld [vmem:[%s2321_s23 + $0x38] sm:$0xff]   ;;  %v400_v5 = vld [vmem:[#allocation2 + $0x80] sm:$0xff] }
  0xab   : > { %1498 = vmatpush3.bf16.msra.mxu0 %v1755_v8  ;;  %1616 = vmatpush3.bf16.msra.mxu1 %v1755_v8  ;;  %v306_v51 = vld [vmem:[%s2288_s19 + $0x38] sm:$0xff]  ;;  %v305_v57 = vld [vmem:[%s2288_s19 + $0x30] sm:$0xff]  ;;  %v404_v45 = vld [vmem:[#allocation2 + $0xa0] sm:$0xff] }
  0xac   : > { %1499 = vmatprep.subr.bf16.mxu0 %v1756_v9  ;;  %1609 = vmatprep.subr.bf16.mxu1 %v1756_v9  ;;  %v314_v52 = vld [vmem:[%s2288_s19 + $0x78] sm:$0xff]  ;;  %v328_v55 = vunpack.c.l.s8.bf16 %v306_v51  ;;  %v313_v58 = vld [vmem:[%s2288_s19 + $0x70] sm:$0xff]  ;;  %v327_v59 = vunpack.c.l.s8.bf16 %v305_v57  ;;  %v330_v61 = vunpack.c.h.s8.bf16 %v306_v51  ;;  %v329_v63 = vunpack.c.h.s8.bf16 %v305_v57  ;;  %v389_v51 = vld [vmem:[#allocation2 + $0x28] sm:$0xff] }
  0xad   : > { %v344_v56 = vunpack.c.l.s8.bf16 %v314_v52  ;;  %v343_v60 = vunpack.c.l.s8.bf16 %v313_v58  ;;  %v346_v62 = vunpack.c.h.s8.bf16 %v314_v52  ;;  %v345_v0 = vunpack.c.h.s8.bf16 %v313_v58  ;;  %v403_v33 = vld [vmem:[#allocation2 + $0x98] sm:$0xff] }
  0xaf   : > { %1500 = vmatpush3.bf16.msra.mxu0 %v1757_v10  ;;  %1617 = vmatpush3.bf16.msra.mxu1 %v1757_v10 }
  0xb0   : > { %1501 = vmatprep.subr.bf16.mxu0 %v1758_v11  ;;  %1610 = vmatprep.subr.bf16.mxu1 %v1758_v11  ;;  %v385_v11 = vld [vmem:[#allocation2 + $0x8] sm:$0xff] }
  0xb3   : > { %1502 = vmatpush3.bf16.msra.mxu0 %v1759_v12  ;;  %1618 = vmatpush3.bf16.msra.mxu1 %v1759_v12 }
  0xb4   : > { %1503 = vmatprep.subr.bf16.mxu0 %v1760_v13  ;;  %1611 = vmatprep.subr.bf16.mxu1 %v1760_v13  ;;  %v401_v13 = vld [vmem:[#allocation2 + $0x88] sm:$0xff] }
  0xb7   : > { %1504 = vmatpush3.bf16.msra.mxu0 %v1761_v14  ;;  %1619 = vmatpush3.bf16.msra.mxu1 %v1761_v14 }
  0xb8   : > { %1505 = vmatprep.subr.bf16.mxu0 %v1762_v15  ;;  %1612 = vmatprep.subr.bf16.mxu1 %v1762_v15 }
  0xbb   : > { %1506 = vmatpush3.bf16.msra.mxu0 %v1763_v16  ;;  %1620 = vmatpush3.bf16.msra.mxu1 %v1763_v16 }
  0xbc   : > { %1507 = vmatprep.subr.bf16.mxu0 %v1764_v17  ;;  %1613 = vmatprep.subr.bf16.mxu1 %v1764_v17 }
  0xbf   : > { %1508 = vmatpush3.bf16.msra.mxu0 %v1765_v18  ;;  %1621 = vmatpush3.bf16.msra.mxu1 %v1765_v18 }
  0xc0   : > { %1509 = vmatprep.subr.bf16.mxu0 %v1766_v19  ;;  %1614 = vmatprep.subr.bf16.mxu1 %v1766_v19 }
  0xc3   : > { %1510 = vmatpush3.bf16.msra.mxu0 %v1767_v20  ;;  %1622 = vmatpush3.bf16.msra.mxu1 %v1767_v20 }
  0xc6   : > { %545 = vmatmul.mubr.bf16.vlgmr.msra.gmra.mrb[0].mxu0 %v315_v23  ;;  %609 = vmatmul.mubr.bf16.vlgmr.msra.gmra.mrb[0].mxu1 %v331_v24  ;;  %v386_v23 = vld [vmem:[#allocation2 + $0x10] sm:$0xff] }
  0xc7   : > { %552 = vmatprep.mubr.bf16.mxu0 %v318_v25  ;;  %616 = vmatprep.mubr.bf16.mxu1 %v334_v26  ;;  %v402_v25 = vld [vmem:[#allocation2 + $0x90] sm:$0xff] }
  0xce   : > { %553 = vmatmul.mubr.bf16.gmra.mrb[4].mxu0 %v317_v29  ;;  %617 = vmatmul.mubr.bf16.gmra.mrb[4].mxu1 %v333_v30 }
  0xcf   : > { %560 = vmatprep.mubr.bf16.mxu0 %v320_v31  ;;  %624 = vmatprep.mubr.bf16.mxu1 %v336_v32  ;;  %v387_v31 = vld [vmem:[#allocation2 + $0x18] sm:$0xff] }
  0xd6   : > { %561 = vmatmul.mubr.bf16.gmra.mrb[8].mxu0 %v319_v35  ;;  %625 = vmatmul.mubr.bf16.gmra.mrb[8].mxu1 %v335_v36 }
  0xd7   : > { %568 = vmatprep.mubr.bf16.mxu0 %v322_v37  ;;  %632 = vmatprep.mubr.bf16.mxu1 %v338_v38 }
  0xde   : > { %569 = vmatmul.mubr.bf16.gmra.mrb[12].mxu0 %v321_v41  ;;  %633 = vmatmul.mubr.bf16.gmra.mrb[12].mxu1 %v337_v42 }
  0xdf   : > { %576 = vmatprep.mubr.bf16.mxu0 %v324_v43  ;;  %640 = vmatprep.mubr.bf16.mxu1 %v340_v44  ;;  %v388_v43 = vld [vmem:[#allocation2 + $0x20] sm:$0xff] }
  0xe6   : > { %577 = vmatmul.mubr.bf16.gmra.mrb[16].mxu0 %v323_v47  ;;  %641 = vmatmul.mubr.bf16.gmra.mrb[16].mxu1 %v339_v48 }
  0xe7   : > { %584 = vmatprep.mubr.bf16.mxu0 %v326_v49  ;;  %648 = vmatprep.mubr.bf16.mxu1 %v342_v50 }
  0xee   : > { %585 = vmatmul.mubr.bf16.gmra.mrb[20].mxu0 %v325_v53  ;;  %649 = vmatmul.mubr.bf16.gmra.mrb[20].mxu1 %v341_v54  ;;  %v405_v53 = vld [vmem:[#allocation2 + $0xa8] sm:$0xff] }
  0xef   : > { %592 = vmatprep.mubr.bf16.mxu0 %v328_v55  ;;  %656 = vmatprep.mubr.bf16.mxu1 %v344_v56 }
  0xf6   : > { %593 = vmatmul.mubr.bf16.gmra.mrb[24].mxu0 %v327_v59  ;;  %657 = vmatmul.mubr.bf16.gmra.mrb[24].mxu1 %v343_v60 }
  0xf7   : > { %600 = vmatprep.mubr.bf16.mxu0 %v330_v61  ;;  %664 = vmatprep.mubr.bf16.mxu1 %v346_v62 }
  0xfe   : > { %601 = vmatmul.mubr.bf16.gmra.mrb[28].mxu0 %v329_v63  ;;  %665 = vmatmul.mubr.bf16.gmra.mrb[28].mxu1 %v345_v0  ;;  %v390_v63 = vld [vmem:[#allocation2 + $0x30] sm:$0xff] }
 0x199   : > { %v1511_v1 = vpop.f32.mrb[0].mxu0  ;;  %v1559_v2 = vpop.f32.mrb[0].mxu1 }
 0x19a   : > { %v1512_v4 = vpop.f32.mrb[1].mxu0  ;;  %v1560_v6 = vpop.f32.mrb[1].mxu1 }
 0x19b   : > { %v1513_v7 = vadd.f32 %v1512_v4, %v1511_v1  ;;  %v1561_v8 = vadd.f32 %v1560_v6, %v1559_v2  ;;  %v1514_v9 = vpop.f32.mrb[2].mxu0  ;;  %v1562_v10 = vpop.f32.mrb[2].mxu1  ;;  %v406_v1 = vld [vmem:[#allocation2 + $0xb0] sm:$0xff] }
 0x19c   : > { %v1515_v12 = vpop.f32.mrb[3].mxu0  ;;  %v1563_v14 = vpop.f32.mrb[3].mxu1 }
 0x19d   : > { %v673_v15 = vadd.f32 %v1513_v7, %v384_v3  ;;  %v689_v16 = vadd.f32 %v1561_v8, %v400_v5  ;;  %v1516_v17 = vadd.f32 %v1515_v12, %v1514_v9  ;;  %v1564_v18 = vadd.f32 %v1563_v14, %v1562_v10  ;;  %v391_v7 = vld [vmem:[#allocation2 + $0x38] sm:$0xff] }
 0x19e   : > { %v407_v9 = vld [vmem:[#allocation2 + $0xb8] sm:$0xff] }
 0x19f   : > { %705 = vst [vmem:[#allocation2] sm:$0xff] %v673_v15  ;;  %721 = vst [vmem:[#allocation2 + $0x80] sm:$0xff] %v689_v16  ;;  %v674_v19 = vadd.f32 %v1516_v17, %v385_v11  ;;  %v690_v20 = vadd.f32 %v1564_v18, %v401_v13 }
 0x1a1   : > { %706 = vst [vmem:[#allocation2 + $0x8] sm:$0xff] %v674_v19  ;;  %722 = vst [vmem:[#allocation2 + $0x88] sm:$0xff] %v690_v20  ;;  %v1517_v21 = vpop.f32.mrb[4].mxu0  ;;  %v1565_v22 = vpop.f32.mrb[4].mxu1  ;;  %v392_v19 = vld [vmem:[#allocation2 + $0x40] sm:$0xff] }
 0x1a2   : > { %v1518_v24 = vpop.f32.mrb[5].mxu0  ;;  %v1566_v26 = vpop.f32.mrb[5].mxu1 }
 0x1a3   : > { %v1519_v27 = vadd.f32 %v1518_v24, %v1517_v21  ;;  %v1567_v28 = vadd.f32 %v1566_v26, %v1565_v22  ;;  %v1520_v29 = vpop.f32.mrb[6].mxu0  ;;  %v1568_v30 = vpop.f32.mrb[6].mxu1  ;;  %v408_v21 = vld [vmem:[#allocation2 + $0xc0] sm:$0xff] }
 0x1a4   : > { %v1521_v32 = vpop.f32.mrb[7].mxu0  ;;  %v1569_v34 = vpop.f32.mrb[7].mxu1 }
 0x1a5   : > { %v675_v35 = vadd.f32 %v1519_v27, %v386_v23  ;;  %v691_v36 = vadd.f32 %v1567_v28, %v402_v25  ;;  %v1522_v37 = vadd.f32 %v1521_v32, %v1520_v29  ;;  %v1570_v38 = vadd.f32 %v1569_v34, %v1568_v30  ;;  %v393_v27 = vld [vmem:[#allocation2 + $0x48] sm:$0xff] }
 0x1a6   : > { %v409_v29 = vld [vmem:[#allocation2 + $0xc8] sm:$0xff] }
 0x1a7   : > { %707 = vst [vmem:[#allocation2 + $0x10] sm:$0xff] %v675_v35  ;;  %723 = vst [vmem:[#allocation2 + $0x90] sm:$0xff] %v691_v36  ;;  %v676_v39 = vadd.f32 %v1522_v37, %v387_v31  ;;  %v692_v40 = vadd.f32 %v1570_v38, %v403_v33 }
 0x1a9   : > { %708 = vst [vmem:[#allocation2 + $0x18] sm:$0xff] %v676_v39  ;;  %724 = vst [vmem:[#allocation2 + $0x98] sm:$0xff] %v692_v40  ;;  %v1523_v41 = vpop.f32.mrb[8].mxu0  ;;  %v1571_v42 = vpop.f32.mrb[8].mxu1  ;;  %v394_v39 = vld [vmem:[#allocation2 + $0x50] sm:$0xff] }
 0x1aa   : > { %v1524_v44 = vpop.f32.mrb[9].mxu0  ;;  %v1572_v46 = vpop.f32.mrb[9].mxu1 }
 0x1ab   : > { %v1525_v47 = vadd.f32 %v1524_v44, %v1523_v41  ;;  %v1573_v48 = vadd.f32 %v1572_v46, %v1571_v42  ;;  %v1526_v49 = vpop.f32.mrb[10].mxu0  ;;  %v1574_v50 = vpop.f32.mrb[10].mxu1  ;;  %v410_v41 = vld [vmem:[#allocation2 + $0xd0] sm:$0xff] }
 0x1ac   : > { %v1527_v52 = vpop.f32.mrb[11].mxu0  ;;  %v1575_v54 = vpop.f32.mrb[11].mxu1 }
 0x1ad   : > { %v677_v55 = vadd.f32 %v1525_v47, %v388_v43  ;;  %v693_v56 = vadd.f32 %v1573_v48, %v404_v45  ;;  %v1528_v57 = vadd.f32 %v1527_v52, %v1526_v49  ;;  %v1576_v58 = vadd.f32 %v1575_v54, %v1574_v50  ;;  %v395_v47 = vld [vmem:[#allocation2 + $0x58] sm:$0xff] }
 0x1ae   : > { %v411_v49 = vld [vmem:[#allocation2 + $0xd8] sm:$0xff] }
 0x1af   : > { %709 = vst [vmem:[#allocation2 + $0x20] sm:$0xff] %v677_v55  ;;  %725 = vst [vmem:[#allocation2 + $0xa0] sm:$0xff] %v693_v56  ;;  %v678_v59 = vadd.f32 %v1528_v57, %v389_v51  ;;  %v694_v60 = vadd.f32 %v1576_v58, %v405_v53 }
 0x1b1   : > { %710 = vst [vmem:[#allocation2 + $0x28] sm:$0xff] %v678_v59  ;;  %726 = vst [vmem:[#allocation2 + $0xa8] sm:$0xff] %v694_v60  ;;  %v1529_v61 = vpop.f32.mrb[12].mxu0  ;;  %v1577_v62 = vpop.f32.mrb[12].mxu1  ;;  %v396_v59 = vld [vmem:[#allocation2 + $0x60] sm:$0xff] }
 0x1b2   : > { %v1530_v0 = vpop.f32.mrb[13].mxu0  ;;  %v1578_v2 = vpop.f32.mrb[13].mxu1 }
 0x1b3   : > { %v1531_v3 = vadd.f32 %v1530_v0, %v1529_v61  ;;  %v1579_v4 = vadd.f32 %v1578_v2, %v1577_v62  ;;  %v1532_v5 = vpop.f32.mrb[14].mxu0  ;;  %v1580_v6 = vpop.f32.mrb[14].mxu1  ;;  %v412_v61 = vld [vmem:[#allocation2 + $0xe0] sm:$0xff] }
 0x1b4   : > { %v1533_v8 = vpop.f32.mrb[15].mxu0  ;;  %v1581_v10 = vpop.f32.mrb[15].mxu1 }
 0x1b5   : > { %v679_v11 = vadd.f32 %v1531_v3, %v390_v63  ;;  %v695_v12 = vadd.f32 %v1579_v4, %v406_v1  ;;  %v1534_v13 = vadd.f32 %v1533_v8, %v1532_v5  ;;  %v1582_v14 = vadd.f32 %v1581_v10, %v1580_v6  ;;  %v397_v3 = vld [vmem:[#allocation2 + $0x68] sm:$0xff] }
 0x1b6   : > { %v413_v5 = vld [vmem:[#allocation2 + $0xe8] sm:$0xff] }
 0x1b7   : > { %711 = vst [vmem:[#allocation2 + $0x30] sm:$0xff] %v679_v11  ;;  %727 = vst [vmem:[#allocation2 + $0xb0] sm:$0xff] %v695_v12  ;;  %v680_v15 = vadd.f32 %v1534_v13, %v391_v7  ;;  %v696_v16 = vadd.f32 %v1582_v14, %v407_v9 }
 0x1b9   : > { %712 = vst [vmem:[#allocation2 + $0x38] sm:$0xff] %v680_v15  ;;  %728 = vst [vmem:[#allocation2 + $0xb8] sm:$0xff] %v696_v16  ;;  %v1535_v17 = vpop.f32.mrb[16].mxu0  ;;  %v1583_v18 = vpop.f32.mrb[16].mxu1  ;;  %v398_v15 = vld [vmem:[#allocation2 + $0x70] sm:$0xff] }
 0x1ba   : > { %v1536_v20 = vpop.f32.mrb[17].mxu0  ;;  %v1584_v22 = vpop.f32.mrb[17].mxu1 }
 0x1bb   : > { %v1537_v23 = vadd.f32 %v1536_v20, %v1535_v17  ;;  %v1585_v24 = vadd.f32 %v1584_v22, %v1583_v18  ;;  %v1538_v25 = vpop.f32.mrb[18].mxu0  ;;  %v1586_v26 = vpop.f32.mrb[18].mxu1  ;;  %v414_v17 = vld [vmem:[#allocation2 + $0xf0] sm:$0xff] }
 0x1bc   : > { %v1539_v28 = vpop.f32.mrb[19].mxu0  ;;  %v1587_v30 = vpop.f32.mrb[19].mxu1 }
 0x1bd   : > { %v681_v31 = vadd.f32 %v1537_v23, %v392_v19  ;;  %v697_v32 = vadd.f32 %v1585_v24, %v408_v21  ;;  %v1540_v33 = vadd.f32 %v1539_v28, %v1538_v25  ;;  %v1588_v34 = vadd.f32 %v1587_v30, %v1586_v26  ;;  %v399_v23 = vld [vmem:[#allocation2 + $0x78] sm:$0xff] }
 0x1be   : > { %v415_v25 = vld [vmem:[#allocation2 + $0xf8] sm:$0xff] }
 0x1bf   : > { %713 = vst [vmem:[#allocation2 + $0x40] sm:$0xff] %v681_v31  ;;  %729 = vst [vmem:[#allocation2 + $0xc0] sm:$0xff] %v697_v32  ;;  %v682_v35 = vadd.f32 %v1540_v33, %v393_v27  ;;  %v698_v36 = vadd.f32 %v1588_v34, %v409_v29  ;;  %v775_v33 = vld [vmem:[%s2302_s25 + $0x10] sm:$0xff] (!%p1327_p9)  ;;  %v773_v34 = vld [vmem:[%s2302_s25] sm:$0xff] (!%p1327_p9) }
 0x1c1   : > { %714 = vst [vmem:[#allocation2 + $0x48] sm:$0xff] %v682_v35  ;;  %730 = vst [vmem:[#allocation2 + $0xc8] sm:$0xff] %v698_v36  ;;  %v1541_v37 = vpop.f32.mrb[20].mxu0  ;;  %v1589_v38 = vpop.f32.mrb[20].mxu1  ;;  %v2001_v35 = vmov (!%p1327_p9), 0   ;;  %v776_v36 = vld [vmem:[%s2302_s25 + $0x18] sm:$0xff] (!%p1327_p9) }
 0x1c2   : > { %v1542_v40 = vpop.f32.mrb[21].mxu0  ;;  %v1590_v42 = vpop.f32.mrb[21].mxu1  ;;  %1769 = vset.pattern.permute.xlu1 (!%p1327_p9), %v2001_v35  ;;  %1768 = vset.pattern.permute.xlu0 (!%p1327_p9), %v2001_v35 }
 0x1c3   : > { %v1543_v43 = vadd.f32 %v1542_v40, %v1541_v37  ;;  %v1591_v44 = vadd.f32 %v1590_v42, %v1589_v38  ;;  %v1544_v45 = vpop.f32.mrb[22].mxu0  ;;  %v1592_v46 = vpop.f32.mrb[22].mxu1  ;;  %817 = vperm.xlu1 (!%p1327_p9), %1769, %v775_v33   ;;  %807 = vperm.xlu0 (!%p1327_p9), %1768, %v773_v34   ;;  %v774_v37 = vld [vmem:[%s2302_s25 + $0x8] sm:$0xff] (!%p1327_p9)  ;;  %v780_v40 = vld [vmem:[%s2302_s25 + $0x38] sm:$0xff] (!%p1327_p9) }
 0x1c4   : > { %v1545_v48 = vpop.f32.mrb[23].mxu0  ;;  %v1593_v50 = vpop.f32.mrb[23].mxu1  ;;  %v778_v38 = vld [vmem:[%s2302_s25 + $0x28] sm:$0xff] (!%p1327_p9) }
 0x1c5   : > { %v683_v51 = vadd.f32 %v1543_v43, %v394_v39  ;;  %v699_v52 = vadd.f32 %v1591_v44, %v410_v41  ;;  %v1546_v53 = vadd.f32 %v1545_v48, %v1544_v45  ;;  %v1594_v54 = vadd.f32 %v1593_v50, %v1592_v46  ;;  %v777_v39 = vld [vmem:[%s2302_s25 + $0x20] sm:$0xff] (!%p1327_p9)  ;;  %v779_v41 = vld [vmem:[%s2302_s25 + $0x30] sm:$0xff] (!%p1327_p9)  ;;  %v782_v42 = vld [vmem:[%s2302_s25 + $0x48] sm:$0xff] (!%p1327_p9) }
 0x1c6   : > { %v781_v43 = vld [vmem:[%s2302_s25 + $0x40] sm:$0xff] (!%p1327_p9)  ;;  %v784_v44 = vld [vmem:[%s2302_s25 + $0x58] sm:$0xff] (!%p1327_p9)  ;;  %v783_v45 = vld [vmem:[%s2302_s25 + $0x50] sm:$0xff] (!%p1327_p9) }
 0x1c7   : > { %715 = vst [vmem:[#allocation2 + $0x50] sm:$0xff] %v683_v51  ;;  %731 = vst [vmem:[#allocation2 + $0xd0] sm:$0xff] %v699_v52  ;;  %v684_v55 = vadd.f32 %v1546_v53, %v395_v47  ;;  %v700_v56 = vadd.f32 %v1594_v54, %v411_v49  ;;  %822 = vperm.xlu1 (!%p1327_p9), %1769, %v776_v36   ;;  %812 = vperm.xlu0 (!%p1327_p9), %1768, %v774_v37   ;;  %v786_v46 = vld [vmem:[%s2302_s25 + $0x68] sm:$0xff] (!%p1327_p9)  ;;  %v785_v47 = vld [vmem:[%s2302_s25 + $0x60] sm:$0xff] (!%p1327_p9) }
 0x1c8   : > { %v788_v48 = vld [vmem:[%s2302_s25 + $0x78] sm:$0xff] (!%p1327_p9)  ;;  %v787_v49 = vld [vmem:[%s2302_s25 + $0x70] sm:$0xff] (!%p1327_p9)  ;;  %v790_v50 = vld [vmem:[%s2302_s25 + $0x88] sm:$0xff] (!%p1327_p9) }
 0x1c9   : > { %716 = vst [vmem:[#allocation2 + $0x58] sm:$0xff] %v684_v55  ;;  %732 = vst [vmem:[#allocation2 + $0xd8] sm:$0xff] %v700_v56  ;;  %v1547_v57 = vpop.f32.mrb[24].mxu0  ;;  %v1595_v58 = vpop.f32.mrb[24].mxu1  ;;  %v789_v51 = vld [vmem:[%s2302_s25 + $0x80] sm:$0xff] (!%p1327_p9)  ;;  %v792_v52 = vld [vmem:[%s2302_s25 + $0x98] sm:$0xff] (!%p1327_p9) }
 0x1ca   : > { %v1548_v60 = vpop.f32.mrb[25].mxu0  ;;  %v1596_v62 = vpop.f32.mrb[25].mxu1  ;;  %v791_v53 = vld [vmem:[%s2302_s25 + $0x90] sm:$0xff] (!%p1327_p9)  ;;  %v794_v54 = vld [vmem:[%s2302_s25 + $0xa8] sm:$0xff] (!%p1327_p9)  ;;  %v793_v55 = vld [vmem:[%s2302_s25 + $0xa0] sm:$0xff] (!%p1327_p9) }
 0x1cb   : > { %v1549_v63 = vadd.f32 %v1548_v60, %v1547_v57  ;;  %v1597_v0 = vadd.f32 %v1596_v62, %v1595_v58  ;;  %v1550_v1 = vpop.f32.mrb[26].mxu0  ;;  %v1598_v2 = vpop.f32.mrb[26].mxu1  ;;  %832 = vperm.xlu1 (!%p1327_p9), %1769, %v778_v38   ;;  %827 = vperm.xlu0 (!%p1327_p9), %1768, %v777_v39   ;;  %v796_v56 = vld [vmem:[%s2302_s25 + $0xb8] sm:$0xff] (!%p1327_p9)  ;;  %v795_v57 = vld [vmem:[%s2302_s25 + $0xb0] sm:$0xff] (!%p1327_p9)  ;;  %v798_v58 = vld [vmem:[%s2302_s25 + $0xc8] sm:$0xff] (!%p1327_p9) }
 0x1cc   : > { %v1551_v4 = vpop.f32.mrb[27].mxu0  ;;  %v1599_v6 = vpop.f32.mrb[27].mxu1  ;;  %v800_v60 = vld [vmem:[%s2302_s25 + $0xd8] sm:$0xff] (!%p1327_p9)  ;;  %v802_v62 = vld [vmem:[%s2302_s25 + $0xe8] sm:$0xff] (!%p1327_p9) }
 0x1cd   : > { %v685_v7 = vadd.f32 %v1549_v63, %v396_v59  ;;  %v701_v8 = vadd.f32 %v1597_v0, %v412_v61  ;;  %v1552_v9 = vadd.f32 %v1551_v4, %v1550_v1  ;;  %v1600_v10 = vadd.f32 %v1599_v6, %v1598_v2  ;;  %v797_v59 = vld [vmem:[%s2302_s25 + $0xc0] sm:$0xff] (!%p1327_p9)  ;;  %v799_v61 = vld [vmem:[%s2302_s25 + $0xd0] sm:$0xff] (!%p1327_p9)  ;;  %v804_v0 = vld [vmem:[%s2302_s25 + $0xf8] sm:$0xff] (!%p1327_p9) }
 0x1ce   : > { %v801_v63 = vld [vmem:[%s2302_s25 + $0xe0] sm:$0xff] (!%p1327_p9)  ;;  %v803_v1 = vld [vmem:[%s2302_s25 + $0xf0] sm:$0xff] (!%p1327_p9)  ;;  %v744_v6 = vld [vmem:[#allocation2 + $0x18] sm:$0xff] (!%p1327_p9) }
 0x1cf   : > { %717 = vst [vmem:[#allocation2 + $0x60] sm:$0xff] %v685_v7  ;;  %733 = vst [vmem:[#allocation2 + $0xe0] sm:$0xff] %v701_v8  ;;  %v686_v11 = vadd.f32 %v1552_v9, %v397_v3  ;;  %v702_v12 = vadd.f32 %v1600_v10, %v413_v5  ;;  %842 = vperm.xlu1 (!%p1327_p9), %1769, %v780_v40   ;;  %837 = vperm.xlu0 (!%p1327_p9), %1768, %v779_v41   ;;  %v743_v4 = vld [vmem:[#allocation2 + $0x10] sm:$0xff] (!%p1327_p9)  ;;  %v741_v5 = vld [vmem:[#allocation2] sm:$0xff] (!%p1327_p9) }
 0x1d0   : > { %v742_v7 = vld [vmem:[#allocation2 + $0x8] sm:$0xff] (!%p1327_p9)  ;;  %v752_v36 = vld [vmem:[#allocation2 + $0x58] sm:$0xff] (!%p1327_p9)  ;;  %v751_v37 = vld [vmem:[#allocation2 + $0x50] sm:$0xff] (!%p1327_p9) }
 0x1d1   : > { %718 = vst [vmem:[#allocation2 + $0x68] sm:$0xff] %v686_v11  ;;  %734 = vst [vmem:[#allocation2 + $0xe8] sm:$0xff] %v702_v12  ;;  %v1553_v13 = vpop.f32.mrb[28].mxu0  ;;  %v1601_v14 = vpop.f32.mrb[28].mxu1 }
 0x1d2   : > { %v1554_v16 = vpop.f32.mrb[29].mxu0  ;;  %v1602_v18 = vpop.f32.mrb[29].mxu1 }
 0x1d3   : > { %v1555_v19 = vadd.f32 %v1554_v16, %v1553_v13  ;;  %v1603_v20 = vadd.f32 %v1602_v18, %v1601_v14  ;;  %v1556_v21 = vpop.f32.mrb[30].mxu0  ;;  %v1604_v22 = vpop.f32.mrb[30].mxu1  ;;  %740 = sbr.rel (%p1327_p9) target bundleno = 644 (0x284), region = 52  ;;  %852 = vperm.xlu1 (!%p1327_p9), %1769, %v782_v42   ;;  %847 = vperm.xlu0 (!%p1327_p9), %1768, %v781_v43   ;;  %v746_v14 = vld [vmem:[#allocation2 + $0x28] sm:$0xff] (!%p1327_p9) }
 0x1d4   : > { %v1557_v24 = vpop.f32.mrb[31].mxu0  ;;  %v1605_v26 = vpop.f32.mrb[31].mxu1 }
 0x1d5   : > { %v687_v27 = vadd.f32 %v1555_v19, %v398_v15  ;;  %v703_v28 = vadd.f32 %v1603_v20, %v414_v17  ;;  %v1558_v29 = vadd.f32 %v1557_v24, %v1556_v21  ;;  %v1606_v30 = vadd.f32 %v1605_v26, %v1604_v22  ;;  %v745_v15 = vld [vmem:[#allocation2 + $0x20] sm:$0xff] (!%p1327_p9)  ;;  %v748_v22 = vld [vmem:[#allocation2 + $0x38] sm:$0xff] (!%p1327_p9) }
 0x1d7   : > { %719 = vst [vmem:[#allocation2 + $0x70] sm:$0xff] %v687_v27  ;;  %735 = vst [vmem:[#allocation2 + $0xf0] sm:$0xff] %v703_v28  ;;  %v688_v31 = vadd.f32 %v1558_v29, %v399_v23  ;;  %v704_v32 = vadd.f32 %v1606_v30, %v415_v25  ;;  %862 = vperm.xlu1 (!%p1327_p9), %1769, %v784_v44   ;;  %857 = vperm.xlu0 (!%p1327_p9), %1768, %v783_v45   ;;  %v747_v23 = vld [vmem:[#allocation2 + $0x30] sm:$0xff] (!%p1327_p9)  ;;  %v750_v29 = vld [vmem:[#allocation2 + $0x48] sm:$0xff] (!%p1327_p9) }
 0x1d8   : > { %v749_v30 = vld [vmem:[#allocation2 + $0x40] sm:$0xff] (!%p1327_p9)  ;;  %v754_v43 = vld [vmem:[#allocation2 + $0x68] sm:$0xff] (!%p1327_p9) }
 0x1d9   : > { %720 = vst [vmem:[#allocation2 + $0x78] sm:$0xff] %v688_v31  ;;  %736 = vst [vmem:[#allocation2 + $0xf8] sm:$0xff] %v704_v32  ;;  %v753_v44 = vld [vmem:[#allocation2 + $0x60] sm:$0xff] (!%p1327_p9) }
 0x1db   : > { %872 = vperm.xlu1 %1769, %v786_v46   ;;  %867 = vperm.xlu0 %1768, %v785_v47  }
 0x1df   : > { %882 = vperm.xlu1 %1769, %v788_v48   ;;  %877 = vperm.xlu0 %1768, %v787_v49  }
 0x1e3   : > { %892 = vperm.xlu1 %1769, %v790_v50   ;;  %887 = vperm.xlu0 %1768, %v789_v51   ;;  %v756_v50 = vld [vmem:[#allocation2 + $0x78] sm:$0xff]  ;;  %v755_v51 = vld [vmem:[#allocation2 + $0x70] sm:$0xff] }
 0x1e7   : > { %902 = vperm.xlu1 %1769, %v792_v52   ;;  %897 = vperm.xlu0 %1768, %v791_v53  }
 0x1eb   : > { %912 = vperm.xlu1 %1769, %v794_v54   ;;  %907 = vperm.xlu0 %1768, %v793_v55  }
 0x1ef   : > { %922 = vperm.xlu1 %1769, %v796_v56   ;;  %917 = vperm.xlu0 %1768, %v795_v57   ;;  %v758_v57 = vld [vmem:[#allocation2 + $0x88] sm:$0xff] }
 0x1f3   : > { %932 = vperm.xlu1 %1769, %v798_v58   ;;  %927 = vperm.xlu0 %1768, %v797_v59   ;;  %v757_v58 = vld [vmem:[#allocation2 + $0x80] sm:$0xff] }
 0x1f7   : > { %942 = vperm.xlu1 %1769, %v800_v60   ;;  %937 = vperm.xlu0 %1768, %v799_v61  }
 0x1fb   : > { %952 = vperm.xlu1 %1769, %v802_v62   ;;  %947 = vperm.xlu0 %1768, %v801_v63  }
 0x1ff   : > { %962 = vperm.xlu1 %1769, %v804_v0   ;;  %957 = vperm.xlu0 %1768, %v803_v1   ;;  %v760_v0 = vld [vmem:[#allocation2 + $0x98] sm:$0xff]  ;;  %v759_v1 = vld [vmem:[#allocation2 + $0x90] sm:$0xff] }
 0x242   : > { %v818_v2 = vpop.permute.xlu1 %817  ;;  %v808_v3 = vpop.permute.xlu0 %807 }
 0x243   : > { %v967_v10 = vmul.f32 %v818_v2, %v743_v4  ;;  %v965_v11 = vmul.f32 %v808_v3, %v741_v5 }
 0x246   : > { %v823_v8 = vpop.permute.xlu1 %822  ;;  %v813_v9 = vpop.permute.xlu0 %812 }
 0x247   : > { %v968_v12 = vmul.f32 %v823_v8, %v744_v6  ;;  %v966_v13 = vmul.f32 %v813_v9, %v742_v7  ;;  %v762_v7 = vld [vmem:[#allocation2 + $0xa8] sm:$0xff]  ;;  %v761_v8 = vld [vmem:[#allocation2 + $0xa0] sm:$0xff] }
 0x249   : > { %v1408_v16 = vpack.c.bf16 %v968_v12, %v967_v10  ;;  %v1403_v17 = vpack.c.bf16 %v966_v13, %v965_v11 }
 0x24a   : > { %v833_v18 = vpop.permute.xlu1 %832  ;;  %v828_v19 = vpop.permute.xlu0 %827 }
 0x24b   : > { %1480 = vst [vmem:[%s2309_s30 + $0x8] sm:$0xff] %v1408_v16   ;;  %1404 = vst [vmem:[%s2309_s30] sm:$0xff] %v1403_v17   ;;  %v970_v20 = vmul.f32 %v833_v18, %v746_v14  ;;  %v969_v21 = vmul.f32 %v828_v19, %v745_v15  ;;  %v764_v14 = vld [vmem:[#allocation2 + $0xb8] sm:$0xff]  ;;  %v763_v15 = vld [vmem:[#allocation2 + $0xb0] sm:$0xff] }
 0x24d   : > { %v1413_v24 = vpack.c.bf16 %v970_v20, %v969_v21  ;;  %v766_v21 = vld [vmem:[#allocation2 + $0xc8] sm:$0xff] }
 0x24e   : > { %v843_v25 = vpop.permute.xlu1 %842  ;;  %v838_v26 = vpop.permute.xlu0 %837 }
 0x24f   : > { %1481 = vst [vmem:[%s2309_s30 + $0x10] sm:$0xff] %v1413_v24   ;;  %v972_v27 = vmul.f32 %v843_v25, %v748_v22  ;;  %v971_v28 = vmul.f32 %v838_v26, %v747_v23  ;;  %v765_v22 = vld [vmem:[#allocation2 + $0xc0] sm:$0xff] }
 0x251   : > { %v1418_v31 = vpack.c.bf16 %v972_v27, %v971_v28  ;;  %v768_v28 = vld [vmem:[#allocation2 + $0xd8] sm:$0xff] }
 0x252   : > { %v853_v32 = vpop.permute.xlu1 %852  ;;  %v848_v33 = vpop.permute.xlu0 %847 }
 0x253   : > { %1482 = vst [vmem:[%s2309_s30 + $0x18] sm:$0xff] %v1418_v31   ;;  %v974_v34 = vmul.f32 %v853_v32, %v750_v29  ;;  %v973_v35 = vmul.f32 %v848_v33, %v749_v30  ;;  %v767_v29 = vld [vmem:[#allocation2 + $0xd0] sm:$0xff] }
 0x255   : > { %v1423_v38 = vpack.c.bf16 %v974_v34, %v973_v35  ;;  %v770_v35 = vld [vmem:[#allocation2 + $0xe8] sm:$0xff] }
 0x256   : > { %v863_v39 = vpop.permute.xlu1 %862  ;;  %v858_v40 = vpop.permute.xlu0 %857 }
 0x257   : > { %1483 = vst [vmem:[%s2309_s30 + $0x20] sm:$0xff] %v1423_v38   ;;  %v976_v41 = vmul.f32 %v863_v39, %v752_v36  ;;  %v975_v42 = vmul.f32 %v858_v40, %v751_v37  ;;  %v769_v36 = vld [vmem:[#allocation2 + $0xe0] sm:$0xff] }
 0x259   : > { %v1428_v45 = vpack.c.bf16 %v976_v41, %v975_v42  ;;  %v772_v42 = vld [vmem:[#allocation2 + $0xf8] sm:$0xff] }
 0x25a   : > { %v873_v46 = vpop.permute.xlu1 %872  ;;  %v868_v47 = vpop.permute.xlu0 %867 }
 0x25b   : > { %1484 = vst [vmem:[%s2309_s30 + $0x28] sm:$0xff] %v1428_v45   ;;  %v978_v48 = vmul.f32 %v873_v46, %v754_v43  ;;  %v977_v49 = vmul.f32 %v868_v47, %v753_v44  ;;  %v771_v43 = vld [vmem:[#allocation2 + $0xf0] sm:$0xff] }
 0x25d   : > { %v1433_v52 = vpack.c.bf16 %v978_v48, %v977_v49 }
 0x25e   : > { %v883_v53 = vpop.permute.xlu1 %882  ;;  %v878_v54 = vpop.permute.xlu0 %877 }
 0x25f   : > { %1485 = vst [vmem:[%s2309_s30 + $0x30] sm:$0xff] %v1433_v52   ;;  %v980_v55 = vmul.f32 %v883_v53, %v756_v50  ;;  %v979_v56 = vmul.f32 %v878_v54, %v755_v51 }
 0x261   : > { %v1438_v59 = vpack.c.bf16 %v980_v55, %v979_v56 }
 0x262   : > { %v893_v60 = vpop.permute.xlu1 %892  ;;  %v888_v61 = vpop.permute.xlu0 %887 }
 0x263   : > { %1486 = vst [vmem:[%s2309_s30 + $0x38] sm:$0xff] %v1438_v59   ;;  %v982_v62 = vmul.f32 %v893_v60, %v758_v57  ;;  %v981_v63 = vmul.f32 %v888_v61, %v757_v58 }
 0x265   : > { %v1443_v2 = vpack.c.bf16 %v982_v62, %v981_v63 }
 0x266   : > { %v903_v3 = vpop.permute.xlu1 %902  ;;  %v898_v4 = vpop.permute.xlu0 %897 }
 0x267   : > { %1487 = vst [vmem:[%s2309_s30 + $0x40] sm:$0xff] %v1443_v2   ;;  %v984_v5 = vmul.f32 %v903_v3, %v760_v0  ;;  %v983_v6 = vmul.f32 %v898_v4, %v759_v1 }
 0x269   : > { %v1448_v9 = vpack.c.bf16 %v984_v5, %v983_v6 }
 0x26a   : > { %v913_v10 = vpop.permute.xlu1 %912  ;;  %v908_v11 = vpop.permute.xlu0 %907 }
 0x26b   : > { %1488 = vst [vmem:[%s2309_s30 + $0x48] sm:$0xff] %v1448_v9   ;;  %v986_v12 = vmul.f32 %v913_v10, %v762_v7  ;;  %v985_v13 = vmul.f32 %v908_v11, %v761_v8 }
 0x26d   : > { %v1453_v16 = vpack.c.bf16 %v986_v12, %v985_v13 }
 0x26e   : > { %v923_v17 = vpop.permute.xlu1 %922  ;;  %v918_v18 = vpop.permute.xlu0 %917 }
 0x26f   : > { %1489 = vst [vmem:[%s2309_s30 + $0x50] sm:$0xff] %v1453_v16   ;;  %v988_v19 = vmul.f32 %v923_v17, %v764_v14  ;;  %v987_v20 = vmul.f32 %v918_v18, %v763_v15 }
 0x271   : > { %v1458_v23 = vpack.c.bf16 %v988_v19, %v987_v20 }
 0x272   : > { %v933_v24 = vpop.permute.xlu1 %932  ;;  %v928_v25 = vpop.permute.xlu0 %927 }
 0x273   : > { %1490 = vst [vmem:[%s2309_s30 + $0x58] sm:$0xff] %v1458_v23   ;;  %v990_v26 = vmul.f32 %v933_v24, %v766_v21  ;;  %v989_v27 = vmul.f32 %v928_v25, %v765_v22 }
 0x275   : > { %v1463_v30 = vpack.c.bf16 %v990_v26, %v989_v27 }
 0x276   : > { %v943_v31 = vpop.permute.xlu1 %942  ;;  %v938_v32 = vpop.permute.xlu0 %937 }
 0x277   : > { %1491 = vst [vmem:[%s2309_s30 + $0x60] sm:$0xff] %v1463_v30   ;;  %v992_v33 = vmul.f32 %v943_v31, %v768_v28  ;;  %v991_v34 = vmul.f32 %v938_v32, %v767_v29 }
 0x279   : > { %v1468_v37 = vpack.c.bf16 %v992_v33, %v991_v34 }
 0x27a   : > { %v953_v38 = vpop.permute.xlu1 %952  ;;  %v948_v39 = vpop.permute.xlu0 %947 }
 0x27b   : > { %1492 = vst [vmem:[%s2309_s30 + $0x68] sm:$0xff] %v1468_v37   ;;  %v994_v40 = vmul.f32 %v953_v38, %v770_v35  ;;  %v993_v41 = vmul.f32 %v948_v39, %v769_v36 }
 0x27d   : > { %v1473_v44 = vpack.c.bf16 %v994_v40, %v993_v41 }
 0x27e   : > { %v963_v45 = vpop.permute.xlu1 %962  ;;  %v958_v46 = vpop.permute.xlu0 %957 }
 0x27f   : > { %1493 = vst [vmem:[%s2309_s30 + $0x70] sm:$0xff] %v1473_v44   ;;  %v996_v47 = vmul.f32 %v963_v45, %v772_v42  ;;  %v995_v48 = vmul.f32 %v958_v46, %v771_v43 }
 0x281   : > { %v1478_v49 = vpack.c.bf16 %v996_v47, %v995_v48 }
 0x283   : > { %1494 = vst [vmem:[%s2309_s30 + $0x78] sm:$0xff] %v1478_v49  }
 0x284 PF: > { %s2517_s18 = sld [smem:[#allocation14_spill]]  ;;  %s2518_s20 = sld [smem:[#allocation20_spill]] }
 0x285   : > { %s1171_s9 = sshll.u32 %s2309_s30, 4  ;;  %s1158_s0 = scalar_lea.sflag [#allocation5], %s2299_s8  ;;  %s2411_s9 = int_to_ptr.vmem [resolvable:$true] %s1171_s9 }
 0x286   : > { %s1858_s19 = scalar_lea.vmem %s2411_s9, 2048  ;;  %s2002_s26 = smov [#allocation9]  }
 0x287   : > { %p1859_p1 = scmp.ne.s32.totalorder %s2411_s9, %s1858_s19  ;;  %s1862_s25 = sshll.u32 %s2002_s26, 4  ;;  %s1863_s25 = int_to_ptr.vmem [resolvable:$false] %s1862_s25 }
 0x288   : > { %s1864_s24 = scalar_lea.vmem %s1863_s25, 4096  ;;  %p1865_p0 = scmp.lt.s32.totalorder %s2411_s9, %s1863_s25 }
 0x289   : > { %p1860_p10 = pnand %p1859_p1, %p2239_p13  ;;  %p1866_p6 = scmp.lt.s32.totalorder %s1864_s24, %s1858_s19 }
 0x28a   : > { %s1399_s28 = sshll.u32 %s2517_s18, 11  ;;  %s2519_s7 = smov %s2518_s20 }
 0x28b   : > { %s2408_s4 = scalar_lea.hbm %s2518_s20, %s1399_s28  ;;  %p1861_p7 = pneg %p1860_p10 }
 0x28c   : > { %p1867_p5 = por %p1866_p6, %p1865_p0 }
 0x28e   : > { %p1868_p8 = pnand %p1867_p5, %p1861_p7 }
 0x290   : > { %1871 = shalt.err (!%p1868_p8)
}
 0x291   : > { %s1872_s30 = scalar_lea.hbm %s2408_s4, 2048  ;;  %s1876_s5 = scalar_lea.hbm %s2519_s7, 4096 }
 0x292   : > { %p1873_p11 = scmp.ne.s32.totalorder %s2408_s4, %s1872_s30  ;;  %p1877_p3 = scmp.lt.u32.totalorder %s2408_s4, %s2519_s7 }
 0x293   : > { %p1878_p4 = scmp.lt.u32.totalorder %s1876_s5, %s1872_s30  ;;  %p1880_p1 = scmp.lt.u32.totalorder %s1872_s30, %s2408_s4 }
 0x294   : > { %p1874_p12 = pnand %p1873_p11, %p2239_p13 }
 0x295   : > { %p1879_p9 = por %p1878_p4, %p1877_p3 }
 0x296   : > { %p1875_p2 = pneg %p1874_p12 }
 0x297   : > { %p1881_p10 = por %p1880_p1, %p1879_p9 }
 0x299   : > { %p1882_p7 = pnand %p1881_p10, %p1875_p2 }
 0x29b   : > { %1885 = shalt.err (!%p1882_p7)
}
 0x29c   : > { %s2003_s28 = smov 64   ;;  %s2004_s27 = smov 4  }
 0x29d   : > { %1631 = dma.vmem_to_hbm [thread:$0]  (%p2239_p13), %s2411_s9, 2048, %s2408_s4, %s1158_s0, %s2003_s28, %s2003_s28, %s2004_s27  }
 0x29e PF: > { %p1651_p0 = scmp.ge.s32.totalorder %s1988_s22, 2  ;;  %s1186_s6 = sand.u32 1, %s1948_s12  }
 0x29f   : > { %p2520_p6 = scmp.ne.s32.totalorder %s2500_s15, 0  ;;  %s1187_s20 = scalar_lea.sflag [#allocation5], %s1186_s6 }
 0x2a1   : > { %p1645_p5 = pnand %p1651_p0, %p2520_p6 }
 0x2a3   : > { %1943 = dma.done.wait (!%p1645_p5), %s1187_s20, 2048  }
 0x2a4   : > { %1945 = vsyncadd (!%p1645_p5), %s1187_s20, 4294965248  ;;  %s20_s22 = sadd.s32 1, %s1988_s22   ;;  %s2521_s29 = sld [smem:[#allocation18_spill]] }
 0x2a5   : > { %p17_p8 = scmp.ge.s32.totalorder %s20_s22, 6   ;;  %s2522_s18 = sld [smem:[#allocation15_spill]] }
 0x2a6   : > { %s2523_s20 = sld [smem:[#allocation16_spill]]  ;;  %s2524_s8 = sld [smem:[#allocation17_spill]] }
 0x2a7   : > { %s2525_s12 = smov %s1952_s13  ;;  %s2526_s13 = smov %s1956_s14 }
 0x2a8   : > { %s2527_s14 = smov %s2227_s10  ;;  %s2528_s15 = smov %s1964_s16 }
 0x2a9   : > { %s2529_s16 = smov %s1968_s17  ;;  %s2531_s19 = smov %s1984_s21 }
 0x2aa   : > { %s2530_s17 = smov %s2521_s29  ;;  %19 = sbr.rel (!%p17_p8) target bundleno = 13 (0xd), region = 101 }
 0x2ac   : > { %s2532_s21 = smov %s2524_s8 }
 0x2b1   :  { %1192 = vsyncpa [#allocation4], 1 }
 0x2b2   :  { %1194 = vsyncpa [#allocation4 + $0x1], 1 }
 0x2b3   :  { %1195 = vsyncpa [#allocation7], 1 }
 0x2b4   :  { %1196 = vsyncpa [#allocation5], 1 }
 0x2b5   :  { %1198 = vsyncpa [#allocation5 + $0x1], 1 }

</bundles_post_ra>
